<compile_context>
chip_gen: v7x
topology: tpu7x:2x2x1
jax: 0.10.0
libtpu: 0.0.40
codegen_flags: <defaults>
</compile_context>

<pallas_src>
import functools
import math

import jax
import jax.numpy as jnp
from jax.experimental import pallas as pl
from jax.experimental.pallas import tpu as pltpu


def flow_nll_partial_kernel(x_ref, w_ref, b_ref, out_ref):
    # x_ref  : (TB, D) f32 VMEM tile of the batch (double-buffered by Pallas)
    # w_ref  : (D, D)  bf16 VMEM, resident (constant index_map)
    # b_ref  : (1, D)  f32 VMEM, resident
    # out_ref: (1, D)  f32 VMEM per-core partial accumulator of sum(z*z);
    #          resident across the inner ("arbitrary") reduction axis.
    i = pl.program_id(1)

    @pl.when(i == 0)
    def _init():
        out_ref[...] = jnp.zeros_like(out_ref)

    # flow.forward(x): affine flow on the MXU.  Cast x -> bf16 on-chip so HBM
    # only ever sees the original f32 x once (kernel is HBM-bound).
    x_bf = x_ref[...].astype(jnp.bfloat16)
    z = jnp.dot(x_bf, w_ref[...], preferred_element_type=jnp.float32)
    z = z + b_ref[...]                                   # (TB, D) f32

    # prior.log_prob(z) only needs sum(z^2) over the batch: keep a lane-wide
    # f32 accumulator (sublane reduce per step; loop-carried dep is one vreg
    # add).  No per-step cross-lane reduce, no SMEM scalar chain, no row mask
    # (padded rows are exactly zero; corrected for in the wrapper).
    out_ref[...] += jnp.sum(z * z, axis=0, keepdims=True)


def flow_nll(x, w, b, logdet, *, max_tile_b=1024):
    """Scalar NLL loss = -(N(0,I).log_prob(x @ W + b) + log|det W|).mean()."""
    B, D = x.shape

    # Batch tiling: one padded block for small B, otherwise 1024-row tiles
    # (multiple of 16 sublanes -> bf16-friendly, well past the per-step
    # overhead knee on the measured tiling curve).
    if B <= max_tile_b:
        tile_b = -(-B // 16) * 16
    else:
        tile_b = max_tile_b
    num_blocks = pl.cdiv(B, tile_b)

    # Split the reduction across (up to) 2 TensorCores via a leading
    # "parallel" grid axis with per-core output slots; on 1-TC chips this
    # just runs sequentially and costs nothing.
    num_splits = 2 if num_blocks >= 2 else 1
    blocks_per_split = pl.cdiv(num_blocks, num_splits)
    total_blocks = num_splits * blocks_per_split
    b_pad = total_blocks * tile_b

    x_in = x.astype(jnp.float32)       # stays f32 in HBM; cast happens on-chip
    if b_pad != B:
        x_in = jnp.pad(x_in, ((0, b_pad - B), (0, 0)))   # exact-zero pad rows
    w_bf = w.astype(jnp.bfloat16)                        # tiny one-off copy
    b_row = b.reshape(1, D).astype(jnp.float32)

    # VMEM budget: double-buffered f32 x tiles + resident W/b + out slots +
    # in-body intermediates (bf16 x copy, f32 z, f32 z*z).
    vmem_bytes = (2 * tile_b * D * 4        # x tiles, f32, double-buffered
                  + 2 * D * D * 2           # W, bf16 (default double buffer)
                  + 2 * D * 4               # bias, f32
                  + 2 * D * 4               # out accumulator window
                  + tile_b * D * (2 + 4 + 4))
    vmem_limit = int(min(max(2 * vmem_bytes, 16 * 1024 * 1024),
                         48 * 1024 * 1024))   # leave headroom on v7x (64 MiB/TC)

    cost = pl.CostEstimate(
        flops=2 * b_pad * D * D + 3 * b_pad * D,
        transcendentals=0,
        bytes_accessed=b_pad * D * 4 + D * D * 2 + D * 4 + num_splits * D * 4,
    )

    partials = pl.pallas_call(
        flow_nll_partial_kernel,
        out_shape=jax.ShapeDtypeStruct((num_splits, D), jnp.float32),
        grid_spec=pltpu.PrefetchScalarGridSpec(
            num_scalar_prefetch=0,
            grid=(num_splits, blocks_per_split),
            in_specs=[
                # x tile: contiguous chunk of batch blocks per core split.
                pl.BlockSpec((tile_b, D),
                             lambda c, i: (c * blocks_per_split + i, 0)),
                pl.BlockSpec((D, D), lambda c, i: (0, 0)),   # W resident
                pl.BlockSpec((1, D), lambda c, i: (0, 0)),   # b resident
            ],
            out_specs=pl.BlockSpec((1, D), lambda c, i: (c, 0)),
        ),
        compiler_params=pltpu.CompilerParams(
            dimension_semantics=("parallel", "arbitrary"),
            vmem_limit_bytes=vmem_limit,
        ),
        cost_estimate=cost,
    )(x_in, w_bf, b_row)

    # Scalar epilogue (negligible): combine per-core partials, remove the
    # padded-row contribution, fold in the Gaussian constant and logdet.
    sum_zz = jnp.sum(partials)
    n_pad = b_pad - B
    if n_pad:
        sum_zz = sum_zz - n_pad * jnp.sum(jnp.square(b.astype(jnp.float32)))
    const = 0.5 * D * math.log(2.0 * math.pi)
    loss = 0.5 * sum_zz / B + const - jnp.asarray(logdet, jnp.float32)
    return loss


def flow_nll_reference(x, w, b, logdet):
    z = x @ w + b[None, :]
    d = z.shape[-1]
    log_prob = -0.5 * jnp.sum(z * z, axis=-1) - 0.5 * d * math.log(2.0 * math.pi)
    return -jnp.mean(log_prob + logdet)


if __name__ == "__main__":
    key = jax.random.PRNGKey(0)

    # --- primary small shape: (batch_size, input_dim) = (8, 128) ---
    B, D = 8, 128
    kx, kw, kb = jax.random.split(key, 3)
    x = jax.random.normal(kx, (B, D), dtype=jnp.float32)
    # Deterministic, well-conditioned invertible flow parameters.
    w = jnp.eye(D, dtype=jnp.float32) + 0.01 * jax.random.normal(kw, (D, D), jnp.float32)
    b = 0.1 * jax.random.normal(kb, (D,), jnp.float32)
    # log|det W| computed in plain JAX (parameter setup, not the hot path).
    _, logdet = jnp.linalg.slogdet(w)

    loss = flow_nll(x, w, b, logdet)
    jax.block_until_ready(loss)
    ref = flow_nll_reference(x, w, b, logdet)
    # bf16 MXU operands (f32 accumulate) vs f32 reference -> loosened tolerance.
    assert jnp.allclose(loss, ref, rtol=2e-2, atol=1e-1), (loss, ref)

    # --- secondary check: grid > 1, per-core split, batch padding correction ---
    B2 = 20
    kx2 = jax.random.fold_in(kx, 1)
    x2 = jax.random.normal(kx2, (B2, D), dtype=jnp.float32)
    # tile_b=16 -> 2 blocks -> grid (2, 1) with the parallel core split, pad to 32.
    loss2 = flow_nll(x2, w, b, logdet, max_tile_b=16)
    jax.block_until_ready(loss2)
    ref2 = flow_nll_reference(x2, w, b, logdet)
    assert jnp.allclose(loss2, ref2, rtol=2e-2, atol=1e-1), (loss2, ref2)

    print("KERNEL_OK")
</pallas_src>

<mosaic_0001>
module attributes {stable_mosaic.version = 11 : i64} {
  func.func @flow_nll_partial_kernel(%arg0: i32, %arg1: i32, %arg2: memref<16x128xf32, #tpu.memory_space<vmem>>, %arg3: memref<128x128xbf16, #tpu.memory_space<vmem>>, %arg4: memref<1x128xf32, #tpu.memory_space<vmem>>, %arg5: memref<1x128xf32, #tpu.memory_space<vmem>>) attributes {dimension_semantics = [#tpu.dimension_semantics<parallel>, #tpu.dimension_semantics<arbitrary>], iteration_bounds = array<i64: 1, 1>, scalar_prefetch = 0 : i64, scratch_operands = 0 : i64, tpu.core_type = #tpu.core_type<tc>, window_params = [{transform_indices = @transform_0, window_bounds = array<i64: 16, 128>}, {pipeline_mode = #tpu.pipeline_mode<synchronous>, transform_indices = @transform_1, window_bounds = array<i64: 128, 128>}, {pipeline_mode = #tpu.pipeline_mode<synchronous>, transform_indices = @transform_2, window_bounds = array<i64: 1, 128>}, {transform_indices = @transform_3, window_bounds = array<i64: 1, 128>}]} {
    %c0_i32 = arith.constant 0 : i32
    %0 = arith.cmpi eq, %arg1, %c0_i32 : i32
    %1 = arith.extui %0 : i1 to i32
    %c0_i32_0 = arith.constant 0 : i32
    %2 = arith.cmpi ne, %1, %c0_i32_0 : i32
    scf.if %2 {
      %cst_11 = arith.constant 0.000000e+00 : f32
      %16 = vector.broadcast %cst_11 : f32 to vector<1x128xf32>
      %c0_12 = arith.constant 0 : index
      %c0_13 = arith.constant 0 : index
      %17 = vector.load %arg5[%c0_12, %c0_13] : memref<1x128xf32, #tpu.memory_space<vmem>>, vector<1x128xf32>
      tpu.vector_store %arg5[%c0_12, %c0_13], %16 {strides = array<i32>} : memref<1x128xf32, #tpu.memory_space<vmem>>, vector<1x128xf32>,
    } else {
    }
    %c0 = arith.constant 0 : index
    %c0_1 = arith.constant 0 : index
    %3 = vector.load %arg2[%c0, %c0_1] : memref<16x128xf32, #tpu.memory_space<vmem>>, vector<16x128xf32>
    %4 = arith.truncf %3 : vector<16x128xf32> to vector<16x128xbf16>
    %c0_2 = arith.constant 0 : index
    %c0_3 = arith.constant 0 : index
    %5 = vector.load %arg3[%c0_2, %c0_3] : memref<128x128xbf16, #tpu.memory_space<vmem>>, vector<128x128xbf16>
    %cst = arith.constant dense<0.000000e+00> : vector<16x128xf32>
    %6 = tpu.matmul %4, %5, %cst {dimension_numbers = #tpu.dot_dimension_numbers<[1], [0], [0], [1], [0, 0, 1, 1], [], []>} : vector<16x128xbf16>, vector<128x128xbf16>, vector<16x128xf32> -> vector<16x128xf32>
    %c0_4 = arith.constant 0 : index
    %c0_5 = arith.constant 0 : index
    %7 = vector.load %arg4[%c0_4, %c0_5] : memref<1x128xf32, #tpu.memory_space<vmem>>, vector<1x128xf32>
    %8 = vector.broadcast %7 : vector<1x128xf32> to vector<16x128xf32>
    %9 = arith.addf %6, %8 : vector<16x128xf32>
    %c0_6 = arith.constant 0 : index
    %c0_7 = arith.constant 0 : index
    %10 = vector.load %arg5[%c0_6, %c0_7] : memref<1x128xf32, #tpu.memory_space<vmem>>, vector<1x128xf32>
    %11 = arith.mulf %9, %9 : vector<16x128xf32>
    %cst_8 = arith.constant dense<0.000000e+00> : vector<128xf32>
    %12 = vector.multi_reduction <add>, %11, %cst_8 [0] : vector<16x128xf32> to vector<128xf32>
    %13 = vector.shape_cast %12 : vector<128xf32> to vector<1x128xf32>
    %14 = arith.addf %10, %13 : vector<1x128xf32>
    %c0_9 = arith.constant 0 : index
    %c0_10 = arith.constant 0 : index
    %15 = vector.load %arg5[%c0_9, %c0_10] : memref<1x128xf32, #tpu.memory_space<vmem>>, vector<1x128xf32>
    tpu.vector_store %arg5[%c0_9, %c0_10], %14 {strides = array<i32>} : memref<1x128xf32, #tpu.memory_space<vmem>>, vector<1x128xf32>,
    return
  }
  func.func @transform_0(%arg0: i32, %arg1: i32) -> (i32, i32) {
    %c1_i32 = arith.constant 1 : i32
    %0 = arith.muli %arg0, %c1_i32 : i32
    %1 = arith.addi %0, %arg1 : i32
    %c0_i32 = arith.constant 0 : i32
    %c0_i32_0 = arith.constant 0 : i32
    return %1, %c0_i32 : i32, i32
  }
  func.func @transform_1(%arg0: i32, %arg1: i32) -> (i32, i32) {
    %c0_i32 = arith.constant 0 : i32
    %c0_i32_0 = arith.constant 0 : i32
    %c0_i32_1 = arith.constant 0 : i32
    return %c0_i32, %c0_i32_0 : i32, i32
  }
  func.func @transform_2(%arg0: i32, %arg1: i32) -> (i32, i32) {
    %c0_i32 = arith.constant 0 : i32
    %c0_i32_0 = arith.constant 0 : i32
    %c0_i32_1 = arith.constant 0 : i32
    return %c0_i32, %c0_i32_0 : i32, i32
  }
  func.func @transform_3(%arg0: i32, %arg1: i32) -> (i32, i32) {
    %c0_i32 = arith.constant 0 : i32
    %c0_i32_0 = arith.constant 0 : i32
    return %arg0, %c0_i32 : i32, i32
  }
}

</mosaic_0001>

<bundles_post_ra>
// kernel: tpu_custom_call.1
= control target key start
LH: loop header
LB: loop body
LE: loop exit
PB: predicated region body
PF: predicated region fallthrough
CT: control target
= control target key end

     0   :  { %8 = vsyncpa [#allocation3], 0  ;;  %s393_s0 = inlined_call_operand.hbm [shape: f32[16,128], index: 0, kind: input, shape index: {}]   ;;  %s394_s1 = inlined_call_operand.hbm [shape: bf16[128,128], index: 1, kind: input, shape index: {}]   ;;  %s395_s2 = inlined_call_operand.vmem [shape: f32[1,128], index: 2, kind: input, shape index: {}]   ;;  %s396_s3 = inlined_call_operand.hbm [shape: f32[1,128], index: 3, kind: output, shape index: {}]  }
   0x1   :  { %9 = vsyncpa [#allocation6], 0 }
   0x2   :  { %10 = vsyncpa [#allocation4], 0  ;;  %s325_s12 = smov [#allocation2]   ;;  %s253_s16 = scalar_lea.hbm %s393_s0, 256 }
   0x3   :  { %s20_s13 = sshll.u32 %s325_s12, 4  ;;  %p254_p0 = scmp.ne.s32.totalorder %s393_s0, %s253_s16  ;;  %s21_s13 = int_to_ptr.vmem [resolvable:$true] %s20_s13 }
   0x4   :  { %p257_p1 = scmp.lt.u32.totalorder %s253_s16, %s393_s0 }
   0x6   :  { %p259_p2 = pnand %p257_p1, %p254_p0 }
   0x8   :  { %262 = shalt.err (!%p259_p2)
}
   0x9   :  { %s263_s21 = scalar_lea.vmem %s21_s13, 256  ;;  %p268_p4 = scmp.lt.s32.totalorder %s21_s13, %s21_s13 }
   0xa   :  { %p264_p3 = scmp.ne.s32.totalorder %s21_s13, %s263_s21  ;;  %p269_p5 = scmp.lt.s32.totalorder %s263_s21, %s263_s21 }
   0xc   :  { %p270_p6 = por %p269_p5, %p268_p4 }
   0xe   :  { %p271_p7 = pnand %p270_p6, %p264_p3 }
  0x10   :  { %274 = shalt.err (!%p271_p7)
}
  0x11   :  { %s326_s22 = smov 128   ;;  %s327_s23 = smov 8  }
  0x12   :  { %26 = dma.hbm_to_vmem [thread:$0]  %s393_s0, 256, %s21_s13, [#allocation3], %s326_s22, %s326_s22, %s327_s23  }
  0x13   :  { %s328_s26 = smov [#allocation5]   ;;  %s275_s30 = scalar_lea.hbm %s394_s1, 1024 }
  0x14   :  { %s32_s27 = sshll.u32 %s328_s26, 4  ;;  %p276_p8 = scmp.ne.s32.totalorder %s394_s1, %s275_s30  ;;  %s33_s27 = int_to_ptr.vmem [resolvable:$true] %s32_s27 }
  0x15   :  { %p279_p9 = scmp.lt.u32.totalorder %s275_s30, %s394_s1 }
  0x17   :  { %p281_p10 = pnand %p279_p9, %p276_p8 }
  0x19   :  { %284 = shalt.err (!%p281_p10)
}
  0x1a   :  { %s285_s8 = scalar_lea.vmem %s33_s27, 1024  ;;  %p290_p12 = scmp.lt.s32.totalorder %s33_s27, %s33_s27 }
  0x1b   :  { %p286_p11 = scmp.ne.s32.totalorder %s33_s27, %s285_s8  ;;  %p291_p13 = scmp.lt.s32.totalorder %s285_s8, %s285_s8 }
  0x1d   :  { %p292_p0 = por %p291_p13, %p290_p12 }
  0x1f   :  { %p293_p1 = pnand %p292_p0, %p286_p11 }
  0x21   :  { %296 = shalt.err (!%p293_p1)
}
  0x22   :  { %s329_s0 = smov 64   ;;  %s330_s9 = smov 4  }
  0x23   :  { %38 = dma.hbm_to_vmem [thread:$0]  %s394_s1, 1024, %s33_s27, [#allocation6], %s329_s0, %s329_s0, %s330_s9  }
  0x24   :  { %319 = dma.done.wait [#allocation3], 256  }
  0x25   :  { %320 = vsyncadd [#allocation3], 4294967040 }
  0x26   :  { %321 = dma.done.wait [#allocation6], 1024  }
  0x27   :  { %322 = vsyncadd [#allocation6], 4294966272  ;;  %v331_v0 = vmov 0.0   ;;  %vm332_vm0 = vmmov 0   ;;  %v245_v1 = vld [vmem:[#allocation5] sm:$0xff]   ;;  %v246_v2 = vld [vmem:[#allocation5 + $0x8] sm:$0xff]  }
  0x28   :  { %216 = vmatprep.subr.bf16.mxu0 %v331_v0  ;;  %54 = vst [vmem:[#allocation7] sm:$0x1] %v331_v0  ;;  %232 = vmatprep.mubr.msk.bf16.mxu0 %vm332_vm0, %v331_v0  ;;  %v247_v3 = vld [vmem:[#allocation5 + $0x10] sm:$0xff]   ;;  %v248_v4 = vld [vmem:[#allocation5 + $0x18] sm:$0xff]   ;;  %v249_v5 = vld [vmem:[#allocation5 + $0x20] sm:$0xff]   ;;  %s333_s13 = smov [#allocation7]  }
  0x29   :  { %217 = vmatpush3.bf16.msra.mxu0 %v245_v1  ;;  %v250_v6 = vld [vmem:[#allocation5 + $0x28] sm:$0xff]   ;;  %v251_v7 = vld [vmem:[#allocation5 + $0x30] sm:$0xff]   ;;  %v252_v8 = vld [vmem:[#allocation5 + $0x38] sm:$0xff]   ;;  %s188_s14 = sshll.u32 %s333_s13, 4  ;;  %s189_s14 = int_to_ptr.vmem [resolvable:$true] %s188_s14 }
  0x2a   :  { %218 = vmatprep.subr.bf16.mxu0 %v331_v0  ;;  %v55_v9 = vld [vmem:[#allocation2] sm:$0xff]  ;;  %v56_v10 = vld [vmem:[#allocation2 + $0x8] sm:$0xff]  ;;  %s301_s15 = scalar_lea.vmem %s189_s14, 32  ;;  %p302_p3 = scmp.lt.s32.totalorder %s189_s14, %s189_s14 }
  0x2b   :  { %v57_v11 = vpack.c.bf16 %v56_v10, %v55_v9  ;;  %v198_v12 = vld [vmem:[%s395_s2] ss:$0 sm:$0xff]  ;;  %s297_s2 = scalar_lea.vmem %s189_s14, 16 }
  0x2c   :  { %p298_p2 = scmp.ne.s32.totalorder %s189_s14, %s297_s2  ;;  %p303_p4 = scmp.lt.s32.totalorder %s301_s15, %s297_s2 }
  0x2d   :  { %219 = vmatpush3.bf16.msra.mxu0 %v246_v2 }
  0x2e   :  { %220 = vmatprep.subr.bf16.mxu0 %v331_v0  ;;  %p304_p5 = por %p303_p4, %p302_p3 }
  0x2f   :  { %v170_v27 = vld [vmem:[#allocation7] sm:$0x1] }
  0x30   :  { %p305_p6 = pnand %p304_p5, %p298_p2 }
  0x31   :  { %221 = vmatpush3.bf16.msra.mxu0 %v247_v3 }
  0x32   :  { %222 = vmatprep.subr.bf16.mxu0 %v331_v0 }
  0x35   :  { %223 = vmatpush3.bf16.msra.mxu0 %v248_v4 }
  0x36   :  { %224 = vmatprep.subr.bf16.mxu0 %v331_v0 }
  0x39   :  { %225 = vmatpush3.bf16.msra.mxu0 %v249_v5 }
  0x3a   :  { %226 = vmatprep.subr.bf16.mxu0 %v331_v0 }
  0x3d   :  { %227 = vmatpush3.bf16.msra.mxu0 %v250_v6 }
  0x3e   :  { %228 = vmatprep.subr.bf16.mxu0 %v331_v0 }
  0x41   :  { %229 = vmatpush3.bf16.msra.mxu0 %v251_v7 }
  0x42   :  { %230 = vmatprep.subr.bf16.mxu0 %v331_v0 }
  0x45   :  { %231 = vmatpush3.bf16.msra.mxu0 %v252_v8 }
  0x48   :  { %233 = vmatmul.mubr.bf16.vlgmr.msra.gmra.mrb[0].mxu0 %v57_v11 }
 0x11b   :  { %v163_v13 = vpop.f32.mrb[0].mxu0 }
 0x11c   :  { %v164_v14 = vadd.f32 %v198_v12, %v163_v13  ;;  %v234_v15 = vpop.f32.mrb[1].mxu0 }
 0x11d   :  { %v166_v16 = vpop.f32.mrb[2].mxu0 }
 0x11e   :  { %v167_v17 = vadd.f32 %v198_v12, %v166_v16  ;;  %v235_v18 = vpop.f32.mrb[3].mxu0  ;;  %v171_v19 = vmul.f32 %v164_v14, %v164_v14 }
 0x120   :  { %v172_v20 = vmul.f32 %v167_v17, %v167_v17 }
 0x122   :  { %v173_v21 = vadd.f32 %v172_v20, %v171_v19 }
 0x124   :  { %v174_v22 = vrot.slane %v173_v21, 4 }
 0x126   :  { %v175_v23 = vadd.f32 %v174_v22, %v173_v21 }
 0x128   :  { %v176_v24 = vrot.slane %v175_v23, 2 }
 0x12a   :  { %v177_v25 = vadd.f32 %v176_v24, %v175_v23 }
 0x12c   :  { %v178_v26 = vrot.slane %v177_v25, 1 }
 0x12e   :  { %v179_v28 = vadd.f32 %v178_v26, %v177_v25 }
 0x130   :  { %v180_v29 = vadd.f32 %v179_v28, %v170_v27 }
 0x132   :  { %181 = vst [vmem:[#allocation7] sm:$0x1] %v180_v29 }
 0x133   :  { %308 = shalt.err (!%p305_p6)
}
 0x134   :  { %s309_s18 = scalar_lea.hbm %s396_s3, 16 }
 0x135   :  { %p310_p7 = scmp.ne.s32.totalorder %s396_s3, %s309_s18  ;;  %p313_p8 = scmp.lt.u32.totalorder %s309_s18, %s396_s3 }
 0x137   :  { %p315_p9 = pnand %p313_p8, %p310_p7 }
 0x139   :  { %318 = shalt.err (!%p315_p9)
}
 0x13a   :  { %191 = dma.vmem_to_hbm [thread:$0]  %s189_s14, 16, %s396_s3, [#allocation4]  }
 0x13b   :  { %323 = dma.done.wait [#allocation4], 16  }
 0x13c   :  { %324 = vsyncadd [#allocation4], 4294967280 }
 0x13d   :  { %195 = vsyncpa [#allocation3], 1 }
 0x13e   :  { %196 = vsyncpa [#allocation6], 1 }
 0x13f   :  { %197 = vsyncpa [#allocation4], 1 }

</bundles_post_ra>
